<compile_context>
chip_gen: v5e
topology: v5e:2x2
jax: 0.10.0
libtpu: 0.0.40
codegen_flags: <defaults>
</compile_context>

<pallas_src>
import math

import jax
import jax.numpy as jnp
from jax import lax
from jax.experimental import pallas as pl
from jax.experimental.pallas import tpu as pltpu

_LANE = 128
_SUBLANE = 8
_SQRT_HALF = 0.7071067811865476


def _gelu_exact(x):
    # PyTorch nn.GELU() default: exact erf-based GELU (kept in f32).
    return 0.5 * x * (1.0 + lax.erf(x * _SQRT_HALF))


def _round_up(a, m):
    return ((a + m - 1) // m) * m


def _feature_pad(size):
    # Lane-dense (unmasked vst) output even for tiny `size` like 32.
    return _round_up(max(size, _LANE), _LANE)


def _choose_tile_b(batch, cap):
    t = min(cap, _round_up(batch, _SUBLANE))
    if t >= _LANE:
        t = (t // _LANE) * _LANE          # MXU/DMA friendly when large
    return max(t, _SUBLANE)


def _largest_divisor_tile(total, cap, align):
    t = max(align, (min(cap, total) // align) * align)
    while t > align and total % t != 0:
        t -= align
    return t


def _vmem_capacity_bytes():
    try:
        return int(pltpu.get_tpu_info().vmem_capacity_bytes)
    except Exception:
        return 64 * 1024 * 1024           # conservative default (v7x per-core)


# ----------------------------------------------------------------------------
# One-time parameter prep (transpose + bf16 cast + pad).  Do NOT call per step.
# ----------------------------------------------------------------------------
def prepare_resblock_params(w, b):
    """w: (S, S) PyTorch Linear weight (rows = output features). b: (S,)."""
    S = w.shape[0]
    S_pad = _feature_pad(S)
    wt = jnp.asarray(w, jnp.float32).T.astype(jnp.bfloat16)        # y = x @ wt
    wt = jnp.pad(wt, ((0, S_pad - S), (0, S_pad - S)))
    bp = jnp.pad(jnp.asarray(b, jnp.float32), (0, S_pad - S)).reshape(1, S_pad)
    return {"wt": wt, "b": bp, "size": S}


# ----------------------------------------------------------------------------
# Kernel 1: whole bf16 weight resident in VMEM (small / medium `size`).
# ----------------------------------------------------------------------------
def _resblock_resident_kernel(x_ref, wt_ref, b_ref, o_ref):
    x = x_ref[...]                                          # (tile_b, S_pad) f32
    y = jnp.dot(x.astype(jnp.bfloat16), wt_ref[...],        # bf16 MXU
                preferred_element_type=jnp.float32)         # f32 accumulate
    y = y + b_ref[...]                                      # f32 bias
    o_ref[...] = (x + _gelu_exact(y)).astype(o_ref.dtype)


def _resident_call(x, wt_p, b_p, size, single_buffer, tile_b):
    B, S = x.shape
    S_pad = wt_p.shape[0]
    vmem_cap = _vmem_capacity_bytes()
    budget = int(0.85 * vmem_cap)
    wt_bufs = 1 if single_buffer else 2

    if tile_b is None:
        tile_b = _choose_tile_b(B, cap=512)

    def vmem_need(tb):
        return (wt_bufs * S_pad * S_pad * 2            # bf16 weight
                + wt_bufs * _SUBLANE * S_pad * 4       # bias (sublane-padded)
                + 4 * tb * S_pad * 4                   # x + out, double buffered
                + (1 << 20))                           # slack

    while vmem_need(tile_b) > budget and tile_b > _SUBLANE:
        tile_b = max(_SUBLANE, _round_up(tile_b // 2, _SUBLANE))

    B_pad = _round_up(B, tile_b)
    n_b = B_pad // tile_b
    # Give both TensorCores of a dual-core chip (v7x) work; costs only one
    # extra ~0.35us grid step on single-core v5e/v6e.
    if n_b == 1 and tile_b >= 2 * _SUBLANE:
        tile_b = _round_up((tile_b + 1) // 2, _SUBLANE)
        B_pad = _round_up(B, tile_b)
        n_b = B_pad // tile_b

    x_p = jnp.pad(x, ((0, B_pad - B), (0, S_pad - S)))   # no-op when aligned

    if single_buffer:
        wt_spec = pl.BlockSpec((S_pad, S_pad), lambda i: (0, 0),
                               pipeline_mode=pl.Buffered(1))
        b_spec = pl.BlockSpec((1, S_pad), lambda i: (0, 0),
                              pipeline_mode=pl.Buffered(1))
    else:
        wt_spec = pl.BlockSpec((S_pad, S_pad), lambda i: (0, 0))
        b_spec = pl.BlockSpec((1, S_pad), lambda i: (0, 0))

    cost = pl.CostEstimate(
        flops=2 * B_pad * S_pad * S_pad,
        transcendentals=B_pad * S_pad,
        bytes_accessed=2 * B_pad * S_pad * 4 + S_pad * S_pad * 2 + S_pad * 4)

    vmem_limit = int(min(max(vmem_need(tile_b), 32 * 1024 * 1024),
                         int(0.95 * vmem_cap)))

    out = pl.pallas_call(
        _resblock_resident_kernel,
        out_shape=jax.ShapeDtypeStruct((B_pad, S_pad), x.dtype),
        grid_spec=pltpu.PrefetchScalarGridSpec(
            num_scalar_prefetch=0,
            grid=(n_b,),
            in_specs=[
                pl.BlockSpec((tile_b, S_pad), lambda i: (i, 0)),   # x tile
                wt_spec,                                           # resident W^T
                b_spec,                                            # resident bias
            ],
            out_specs=pl.BlockSpec((tile_b, S_pad), lambda i: (i, 0)),
        ),
        compiler_params=pltpu.CompilerParams(
            dimension_semantics=("parallel",),
            vmem_limit_bytes=vmem_limit),
        cost_estimate=cost,
    )(x_p, wt_p, b_p)
    return out[:B, :size]


def resblock_resident(x, wt_p, b_p, size, *, tile_b=None):
    try:
        return _resident_call(x, wt_p, b_p, size, True, tile_b)
    except Exception:
        # Fallback for builds that reject pl.Buffered(1) single-buffering
        # (tile_b is re-derived against the doubled weight footprint).
        return _resident_call(x, wt_p, b_p, size, False, tile_b)


# ----------------------------------------------------------------------------
# Kernel 2: weight-panel path for large `size` (weight not fully VMEM-resident).
# One full-K matmul per grid step: resident bf16 x-row block @ streamed panel.
# ----------------------------------------------------------------------------
def _resblock_panel_kernel(xmm_ref, xres_ref, wt_ref, b_ref, o_ref):
    y = jnp.dot(xmm_ref[...], wt_ref[...],                  # bf16 MXU, full K
                preferred_element_type=jnp.float32)
    y = y + b_ref[...]                                      # f32 bias
    o_ref[...] = (xres_ref[...] + _gelu_exact(y)).astype(o_ref.dtype)


def _tiled_call(x, wt_p, b_p, size, single_buffer, tile_b, tile_n):
    B, S = x.shape
    S_pad = wt_p.shape[0]
    vmem_cap = _vmem_capacity_bytes()
    budget = int(0.85 * vmem_cap)
    align = 2 * _LANE if S_pad % (2 * _LANE) == 0 else _LANE
    x_bufs = 1 if single_buffer else 2

    if tile_n is None:
        tile_n = _largest_divisor_tile(S_pad, 768, align)
    assert S_pad % tile_n == 0 and tile_n % _LANE == 0
    if tile_b is None:
        tile_b = _choose_tile_b(B, cap=1024)
    assert tile_b % _SUBLANE == 0

    def vmem_need(tb, tn):
        return (x_bufs * tb * S_pad * 2       # resident bf16 x row-block
                + 2 * S_pad * tn * 2          # streamed bf16 weight panel
                + 2 * _SUBLANE * tn * 4       # bias panel
                + 2 * tb * tn * 4             # residual tile (f32)
                + 2 * tb * tn * 4             # out tile (f32)
                + (2 << 20))                  # slack

    while vmem_need(tile_b, tile_n) > budget and tile_b > _SUBLANE:
        tile_b = max(_SUBLANE, _round_up(tile_b // 2, _SUBLANE))
    while vmem_need(tile_b, tile_n) > budget and tile_n > align:
        tile_n = _largest_divisor_tile(S_pad, tile_n // 2, align)

    B_pad = _round_up(B, tile_b)
    n_b, n_n = B_pad // tile_b, S_pad // tile_n

    x_f32 = jnp.pad(x, ((0, B_pad - B), (0, S_pad - S)))    # residual stream
    x_bf16 = x_f32.astype(jnp.bfloat16)                     # matmul operand

    if single_buffer:
        xmm_spec = pl.BlockSpec((tile_b, S_pad), lambda i, j: (i, 0),
                                pipeline_mode=pl.Buffered(1))
    else:
        xmm_spec = pl.BlockSpec((tile_b, S_pad), lambda i, j: (i, 0))

    cost = pl.CostEstimate(
        flops=2 * B_pad * S_pad * S_pad,
        transcendentals=B_pad * S_pad,
        bytes_accessed=(B_pad * S_pad * 2 + B_pad * S_pad * 4   # x bf16 + f32
                        + n_b * S_pad * S_pad * 2               # weight panels
                        + B_pad * S_pad * 4))                   # out

    vmem_limit = int(min(max(vmem_need(tile_b, tile_n), 32 * 1024 * 1024),
                         int(0.95 * vmem_cap)))

    out = pl.pallas_call(
        _resblock_panel_kernel,
        out_shape=jax.ShapeDtypeStruct((B_pad, S_pad), jnp.float32),
        grid_spec=pltpu.PrefetchScalarGridSpec(
            num_scalar_prefetch=0,
            grid=(n_b, n_n),
            in_specs=[
                xmm_spec,                                             # x (matmul, bf16)
                pl.BlockSpec((tile_b, tile_n), lambda i, j: (i, j)),  # x (residual)
                pl.BlockSpec((S_pad, tile_n), lambda i, j: (0, j)),   # weight panel
                pl.BlockSpec((1, tile_n), lambda i, j: (0, j)),       # bias panel
            ],
            out_specs=pl.BlockSpec((tile_b, tile_n), lambda i, j: (i, j)),
        ),
        compiler_params=pltpu.CompilerParams(
            dimension_semantics=("parallel", "parallel"),
            vmem_limit_bytes=vmem_limit),
        cost_estimate=cost,
    )(x_bf16, x_f32, wt_p, b_p)
    return out[:B, :size].astype(x.dtype)


def resblock_tiled(x, wt_p, b_p, size, *, tile_b=None, tile_n=None):
    try:
        return _tiled_call(x, wt_p, b_p, size, True, tile_b, tile_n)
    except Exception:
        return _tiled_call(x, wt_p, b_p, size, False, tile_b, tile_n)


# ----------------------------------------------------------------------------
# Dispatcher: keep the bf16 weight resident when it fits in ~VMEM/3, else
# stream weight panels with full-K matmuls.
# ----------------------------------------------------------------------------
def resblock(x, params, **kwargs):
    """x: (B, size) float32.  params: from prepare_resblock_params()."""
    wt_p, b_p, size = params["wt"], params["b"], params["size"]
    S_pad = wt_p.shape[0]
    vmem_cap = _vmem_capacity_bytes()
    if S_pad * S_pad * 2 <= vmem_cap // 3:
        return resblock_resident(x, wt_p, b_p, size, **kwargs)
    return resblock_tiled(x, wt_p, b_p, size, **kwargs)


if __name__ == "__main__":
    key = jax.random.PRNGKey(0)
    kx, kw, kb, kx2, kw2, kb2 = jax.random.split(key, 6)

    # --- Small shape implied by the module (resident path): batch=8, size=32. ---
    B, S = 8, 32
    x = jax.random.normal(kx, (B, S), dtype=jnp.float32)
    bound = 1.0 / math.sqrt(S)
    w = jax.random.uniform(kw, (S, S), jnp.float32, -bound, bound)  # PyTorch layout
    b = jax.random.uniform(kb, (S,), jnp.float32, -bound, bound)

    params = prepare_resblock_params(w, b)       # one-time transpose/cast/pad
    out = jax.block_until_ready(resblock(x, params))

    ref = x + jax.nn.gelu(x @ w.T + b, approximate=False)
    assert out.shape == ref.shape
    # bf16 MXU inputs => loosened tolerance vs the f32 reference.
    assert jnp.allclose(out, ref, atol=3e-2, rtol=3e-2), "resident-path mismatch"

    # --- Exercise the weight-panel path (used for large `size`) with an
    #     unaligned batch/size so padding + multi-tile grid are covered. ---
    B2, S2 = 50, 200
    x2 = jax.random.normal(kx2, (B2, S2), dtype=jnp.float32)
    bound2 = 1.0 / math.sqrt(S2)
    w2 = jax.random.uniform(kw2, (S2, S2), jnp.float32, -bound2, bound2)
    b2 = jax.random.uniform(kb2, (S2,), jnp.float32, -bound2, bound2)
    params2 = prepare_resblock_params(w2, b2)

    out2 = jax.block_until_ready(
        resblock_tiled(x2, params2["wt"], params2["b"], params2["size"],
                       tile_b=32, tile_n=128))
    ref2 = x2 + jax.nn.gelu(x2 @ w2.T + b2, approximate=False)
    assert jnp.allclose(out2, ref2, atol=3e-2, rtol=3e-2), "tiled-path mismatch"

    print("KERNEL_OK")
</pallas_src>

<mosaic_0001>
module attributes {stable_mosaic.version = 11 : i64} {
  func.func @_resblock_resident_kernel(%arg0: i32, %arg1: memref<8x128xf32, #tpu.memory_space<vmem>>, %arg2: memref<128x128xbf16, #tpu.memory_space<vmem>>, %arg3: memref<1x128xf32, #tpu.memory_space<vmem>>, %arg4: memref<8x128xf32, #tpu.memory_space<vmem>>) attributes {dimension_semantics = [#tpu.dimension_semantics<parallel>], iteration_bounds = array<i64: 1>, scalar_prefetch = 0 : i64, scratch_operands = 0 : i64, tpu.core_type = #tpu.core_type<tc>, window_params = [{transform_indices = @transform_0, window_bounds = array<i64: 8, 128>}, {pipeline_mode = #tpu.pipeline_mode<synchronous>, transform_indices = @transform_1, window_bounds = array<i64: 128, 128>}, {pipeline_mode = #tpu.pipeline_mode<synchronous>, transform_indices = @transform_2, window_bounds = array<i64: 1, 128>}, {transform_indices = @transform_3, window_bounds = array<i64: 8, 128>}]} {
    %c0 = arith.constant 0 : index
    %c0_0 = arith.constant 0 : index
    %0 = vector.load %arg1[%c0, %c0_0] : memref<8x128xf32, #tpu.memory_space<vmem>>, vector<8x128xf32>
    %1 = arith.truncf %0 : vector<8x128xf32> to vector<8x128xbf16>
    %c0_1 = arith.constant 0 : index
    %c0_2 = arith.constant 0 : index
    %2 = vector.load %arg2[%c0_1, %c0_2] : memref<128x128xbf16, #tpu.memory_space<vmem>>, vector<128x128xbf16>
    %cst = arith.constant dense<0.000000e+00> : vector<8x128xf32>
    %3 = tpu.matmul %1, %2, %cst {dimension_numbers = #tpu.dot_dimension_numbers<[1], [0], [0], [1], [0, 0, 1, 1], [], []>} : vector<8x128xbf16>, vector<128x128xbf16>, vector<8x128xf32> -> vector<8x128xf32>
    %c0_3 = arith.constant 0 : index
    %c0_4 = arith.constant 0 : index
    %4 = vector.load %arg3[%c0_3, %c0_4] : memref<1x128xf32, #tpu.memory_space<vmem>>, vector<1x128xf32>
    %5 = vector.broadcast %4 : vector<1x128xf32> to vector<8x128xf32>
    %6 = arith.addf %3, %5 : vector<8x128xf32>
    %cst_5 = arith.constant 5.000000e-01 : f32
    %7 = vector.broadcast %cst_5 : f32 to vector<8x128xf32>
    %8 = arith.mulf %7, %6 : vector<8x128xf32>
    %cst_6 = arith.constant 0.707106769 : f32
    %9 = vector.broadcast %cst_6 : f32 to vector<8x128xf32>
    %10 = arith.mulf %6, %9 : vector<8x128xf32>
    %11 = math.erf %10 : vector<8x128xf32>
    %cst_7 = arith.constant 1.000000e+00 : f32
    %12 = vector.broadcast %cst_7 : f32 to vector<8x128xf32>
    %13 = arith.addf %12, %11 : vector<8x128xf32>
    %14 = arith.mulf %8, %13 : vector<8x128xf32>
    %15 = arith.addf %0, %14 : vector<8x128xf32>
    %c0_8 = arith.constant 0 : index
    %c0_9 = arith.constant 0 : index
    %16 = vector.load %arg4[%c0_8, %c0_9] : memref<8x128xf32, #tpu.memory_space<vmem>>, vector<8x128xf32>
    tpu.vector_store %arg4[%c0_8, %c0_9], %15 {strides = array<i32>} : memref<8x128xf32, #tpu.memory_space<vmem>>, vector<8x128xf32>,
    return
  }
  func.func @transform_0(%arg0: i32) -> (i32, i32) {
    %c0_i32 = arith.constant 0 : i32
    %c0_i32_0 = arith.constant 0 : i32
    return %arg0, %c0_i32 : i32, i32
  }
  func.func @transform_1(%arg0: i32) -> (i32, i32) {
    %c0_i32 = arith.constant 0 : i32
    %c0_i32_0 = arith.constant 0 : i32
    %c0_i32_1 = arith.constant 0 : i32
    return %c0_i32, %c0_i32_0 : i32, i32
  }
  func.func @transform_2(%arg0: i32) -> (i32, i32) {
    %c0_i32 = arith.constant 0 : i32
    %c0_i32_0 = arith.constant 0 : i32
    %c0_i32_1 = arith.constant 0 : i32
    return %c0_i32, %c0_i32_0 : i32, i32
  }
  func.func @transform_3(%arg0: i32) -> (i32, i32) {
    %c0_i32 = arith.constant 0 : i32
    %c0_i32_0 = arith.constant 0 : i32
    return %arg0, %c0_i32 : i32, i32
  }
}

module attributes {stable_mosaic.version = 11 : i64} {
  func.func @_resblock_resident_kernel(%arg0: i32, %arg1: memref<8x128xf32, #tpu.memory_space<vmem>>, %arg2: memref<128x128xbf16, #tpu.memory_space<vmem>>, %arg3: memref<1x128xf32, #tpu.memory_space<vmem>>, %arg4: memref<8x128xf32, #tpu.memory_space<vmem>>) attributes {dimension_semantics = [#tpu.dimension_semantics<parallel>], iteration_bounds = array<i64: 1>, scalar_prefetch = 0 : i64, scratch_operands = 0 : i64, tpu.core_type = #tpu.core_type<tc>, window_params = [{transform_indices = @transform_0, window_bounds = array<i64: 8, 128>}, {pipeline_mode = #tpu.pipeline_mode<synchronous>, transform_indices = @transform_1, window_bounds = array<i64: 128, 128>}, {pipeline_mode = #tpu.pipeline_mode<synchronous>, transform_indices = @transform_2, window_bounds = array<i64: 1, 128>}, {transform_indices = @transform_3, window_bounds = array<i64: 8, 128>}]} {
    %c0 = arith.constant 0 : index
    %c0_0 = arith.constant 0 : index
    %0 = vector.load %arg1[%c0, %c0_0] : memref<8x128xf32, #tpu.memory_space<vmem>>, vector<8x128xf32>
    %1 = arith.truncf %0 : vector<8x128xf32> to vector<8x128xbf16>
    %c0_1 = arith.constant 0 : index
    %c0_2 = arith.constant 0 : index
    %2 = vector.load %arg2[%c0_1, %c0_2] : memref<128x128xbf16, #tpu.memory_space<vmem>>, vector<128x128xbf16>
    %cst = arith.constant dense<0.000000e+00> : vector<8x128xf32>
    %3 = tpu.matmul %1, %2, %cst {dimension_numbers = #tpu.dot_dimension_numbers<[1], [0], [0], [1], [0, 0, 1, 1], [], []>} : vector<8x128xbf16>, vector<128x128xbf16>, vector<8x128xf32> -> vector<8x128xf32>
    %c0_3 = arith.constant 0 : index
    %c0_4 = arith.constant 0 : index
    %4 = vector.load %arg3[%c0_3, %c0_4] : memref<1x128xf32, #tpu.memory_space<vmem>>, vector<1x128xf32>
    %5 = vector.broadcast %4 : vector<1x128xf32> to vector<8x128xf32>
    %6 = arith.addf %3, %5 : vector<8x128xf32>
    %cst_5 = arith.constant 5.000000e-01 : f32
    %7 = vector.broadcast %cst_5 : f32 to vector<8x128xf32>
    %8 = arith.mulf %7, %6 : vector<8x128xf32>
    %cst_6 = arith.constant 0.707106769 : f32
    %9 = vector.broadcast %cst_6 : f32 to vector<8x128xf32>
    %10 = arith.mulf %6, %9 : vector<8x128xf32>
    %11 = math.erf %10 : vector<8x128xf32>
    %cst_7 = arith.constant 1.000000e+00 : f32
    %12 = vector.broadcast %cst_7 : f32 to vector<8x128xf32>
    %13 = arith.addf %12, %11 : vector<8x128xf32>
    %14 = arith.mulf %8, %13 : vector<8x128xf32>
    %15 = arith.addf %0, %14 : vector<8x128xf32>
    %c0_8 = arith.constant 0 : index
    %c0_9 = arith.constant 0 : index
    %16 = vector.load %arg4[%c0_8, %c0_9] : memref<8x128xf32, #tpu.memory_space<vmem>>, vector<8x128xf32>
    tpu.vector_store %arg4[%c0_8, %c0_9], %15 {strides = array<i32>} : memref<8x128xf32, #tpu.memory_space<vmem>>, vector<8x128xf32>,
    return
  }
  func.func @transform_0(%arg0: i32) -> (i32, i32) {
    %c0_i32 = arith.constant 0 : i32
    %c0_i32_0 = arith.constant 0 : i32
    return %arg0, %c0_i32 : i32, i32
  }
  func.func @transform_1(%arg0: i32) -> (i32, i32) {
    %c0_i32 = arith.constant 0 : i32
    %c0_i32_0 = arith.constant 0 : i32
    %c0_i32_1 = arith.constant 0 : i32
    return %c0_i32, %c0_i32_0 : i32, i32
  }
  func.func @transform_2(%arg0: i32) -> (i32, i32) {
    %c0_i32 = arith.constant 0 : i32
    %c0_i32_0 = arith.constant 0 : i32
    %c0_i32_1 = arith.constant 0 : i32
    return %c0_i32, %c0_i32_0 : i32, i32
  }
  func.func @transform_3(%arg0: i32) -> (i32, i32) {
    %c0_i32 = arith.constant 0 : i32
    %c0_i32_0 = arith.constant 0 : i32
    return %arg0, %c0_i32 : i32, i32
  }
}

</mosaic_0001>

<bundles_post_ra>
// kernel: tpu_custom_call.1
= control target key start
LH: loop header
LB: loop body
LE: loop exit
PB: predicated region body
PF: predicated region fallthrough
CT: control target
= control target key end

     0   :  { %8 = vsyncpa [#allocation3], 0  ;;  %s356_s0 = inlined_call_operand.hbm [shape: f32[8,128], index: 0, kind: input, shape index: {}]   ;;  %s357_s1 = inlined_call_operand.hbm [shape: bf16[128,128], index: 1, kind: input, shape index: {}]   ;;  %s358_s2 = inlined_call_operand.vmem [shape: f32[1,128], index: 2, kind: input, shape index: {}]   ;;  %s359_s3 = inlined_call_operand.hbm [shape: f32[8,128], index: 3, kind: output, shape index: {}]  }
   0x1   :  { %9 = vsyncpa [#allocation6], 0 }
   0x2   :  { %10 = vsyncpa [#allocation4], 0  ;;  %s16_s14 = sshll.u32 %s356_s0, 4  ;;  %s319_s15 = smov [#allocation2]   ;;  %s17_s14 = int_to_ptr.hbm [resolvable:$true] %s16_s14 }
   0x3   :  { %s18_s16 = sshll.u32 %s319_s15, 4  ;;  %s26_s19 = sshll.u32 %s357_s1, 4  ;;  %s19_s16 = int_to_ptr.vmem [resolvable:$true] %s18_s16  ;;  %s27_s19 = int_to_ptr.hbm [resolvable:$true] %s26_s19 }
   0x4   :  { %21 = dma.hbm_to_vmem [thread:$0]  %s17_s14, 128, %s19_s16, [#allocation3]  }
   0x5   :  { %s320_s20 = smov [#allocation5]   ;;  %s321_s22 = smov 64  }
   0x6   :  { %s28_s21 = sshll.u32 %s320_s20, 4  ;;  %s322_s23 = smov 4   ;;  %s29_s21 = int_to_ptr.vmem [resolvable:$true] %s28_s21 }
   0x7   :  { %34 = dma.hbm_to_vmem [thread:$0]  %s27_s19, 1024, %s29_s21, [#allocation6], %s321_s22, %s321_s22, %s322_s23  }
   0x8   :  { %313 = dma.done.wait [#allocation3], 128  }
   0x9   :  { %314 = vsyncadd [#allocation3], 4294967168 }
   0xa   :  { %315 = dma.done.wait [#allocation6], 1024  }
   0xb   :  { %316 = vsyncadd [#allocation6], 4294966272  ;;  %v232_v0 = vld [vmem:[#allocation5 + $0x38] sm:$0xff]  ;;  %v231_v1 = vld [vmem:[#allocation5 + $0x30] sm:$0xff]  ;;  %s181_s27 = sshll.u32 %s359_s3, 4  ;;  %s182_s27 = int_to_ptr.hbm [resolvable:$true] %s181_s27 }
   0xc   :  { %115 = vmatpush.bf16.msra.mxu0 %v232_v0  ;;  %v230_v2 = vld [vmem:[#allocation5 + $0x28] sm:$0xff]  ;;  %v229_v3 = vld [vmem:[#allocation5 + $0x20] sm:$0xff]  ;;  %v228_v4 = vld [vmem:[#allocation5 + $0x18] sm:$0xff] }
   0xd   :  { %v227_v5 = vld [vmem:[#allocation5 + $0x10] sm:$0xff]  ;;  %v226_v6 = vld [vmem:[#allocation5 + $0x8] sm:$0xff]  ;;  %v225_v7 = vld [vmem:[#allocation5] sm:$0xff] }
   0xe   :  { %v45_v8 = vld [vmem:[#allocation2] sm:$0xff] }
   0xf   :  { %v46_v9 = vpack.c.bf16 %v45_v8, %v45_v8  ;;  %v238_v10 = vld [vmem:[%s358_s2] ss:$0 sm:$0xff]  ;;  %s323_s2 = smov [#allocation7]  }
  0x10   :  { %116 = vmatpush.bf16.msra.mxu0 %v231_v1  ;;  %s179_s24 = sshll.u32 %s323_s2, 4  ;;  %s180_s24 = int_to_ptr.vmem [resolvable:$true] %s179_s24 }
  0x14   :  { %117 = vmatpush.bf16.msra.mxu0 %v230_v2 }
  0x18   :  { %118 = vmatpush.bf16.msra.mxu0 %v229_v3 }
  0x1c   :  { %119 = vmatpush.bf16.msra.mxu0 %v228_v4 }
  0x20   :  { %120 = vmatpush.bf16.msra.mxu0 %v227_v5 }
  0x24   :  { %121 = vmatpush.bf16.msra.mxu0 %v226_v6 }
  0x28   :  { %122 = vmatpush.bf16.msra.mxu0 %v225_v7 }
  0x2b   :  { %123 = vmatmul.bf16.vlgmr.msra.gmra.mxu0 %v46_v9 }
  0xa8   :  { %v124_v11 = vpop.f32.mrf.mxu0 }
  0xa9   :  { %v125_v12 = vadd.f32 %v238_v10, %v124_v11 }
  0xab   :  { %v129_v13 = vmul.f32 0.70710677, %v125_v12  ;;  %v128_v50 = vmul.f32 0.5, %v125_v12 }
  0xad   :  { %v130_v14 = vmul.f32 %v129_v13, %v129_v13 }
  0xaf   :  { %v131_v15 = vmin.f32 %v130_v14, 16.0 }
  0xb0   :  { %v126_v16 = vpop.f32.mrf.mxu0 }
  0xb1   :  { %v132_v17 = vmul.f32 2.1237322e-06, %v131_v15  ;;  %v143_v18 = vmul.f32 3.8918573e-05, %v131_v15 }
  0xb3   :  { %v133_v19 = vadd.f32 0.00028619796, %v132_v17  ;;  %v144_v20 = vadd.f32 0.001143296, %v143_v18 }
  0xb5   :  { %v134_v21 = vmul.f32 %v133_v19, %v131_v15  ;;  %v145_v22 = vmul.f32 %v144_v20, %v131_v15 }
  0xb7   :  { %v146_v23 = vadd.f32 0.014752088, %v145_v22  ;;  %v135_v24 = vadd.f32 0.0036580483, %v134_v21 }
  0xb9   :  { %v147_v25 = vmul.f32 %v146_v23, %v131_v15  ;;  %v136_v27 = vmul.f32 %v135_v24, %v131_v15 }
  0xbb   :  { %v148_v26 = vadd.f32 0.112945676, %v147_v25  ;;  %v137_v30 = vadd.f32 0.05243302, %v136_v27 }
  0xbd   :  { %v149_v28 = vmul.f32 %v148_v26, %v131_v15  ;;  %v138_v33 = vmul.f32 %v137_v30, %v131_v15 }
  0xbf   :  { %v150_v29 = vadd.f32 0.4994258, %v149_v28  ;;  %v139_v34 = vadd.f32 0.18741608, %v138_v33 }
  0xc1   :  { %v151_v31 = vmul.f32 %v150_v29, %v131_v15  ;;  %v140_v36 = vmul.f32 %v139_v34, %v131_v15 }
  0xc3   :  { %v152_v32 = vadd.f32 1.0, %v151_v31  ;;  %v141_v40 = vadd.f32 1.1283791, %v140_v36 }
  0xc5   :  { %239 = vrcp.f32 %v152_v32  ;;  %v164_v39 = vand.u32 2147483648, %v152_v32  ;;  %v162_v42 = vand.u32 2147483647, %v152_v32  ;;  %vm158_vm1 = vweird.f32 %v152_v32 }
  0xc6   :  { %v142_v45 = vmul.f32 %v141_v40, %v129_v13 }
  0xc7   :  { %v165_v44 = vor.u32 1.1754944e-38, %v164_v39  ;;  %vm163_vm3 = vcmp.eq.f32.partialorder %v162_v42, 8.507059e+37 }
  0xcb   :  { %v240_v35 = vpop.eup %239 }
  0xcc   :  { %v154_v37 = vmul.f32 %v240_v35, %v152_v32  ;;  %vm159_vm0 = vweird.f32 %v240_v35 }
  0xcd   :  { %vm160_vm2 = vmor %vm158_vm1, %vm159_vm0 }
  0xce   :  { %v155_v38 = vsub.f32 1.0, %v154_v37 }
  0xd0   :  { %v156_v41 = vmul.f32 %v240_v35, %v155_v38 }
  0xd2   :  { %v157_v43 = vadd.f32 %v240_v35, %v156_v41 }
  0xd4   :  { %v161_v46 = vsel %vm160_vm2, %v240_v35, %v157_v43 }
  0xd5   :  { %v166_v47 = vsel %vm163_vm3, %v165_v44, %v161_v46 }
  0xd6   :  { %v167_v48 = vmul.f32 %v166_v47, %v142_v45 }
  0xd8   :  { %v224_v49 = vclamps-f32 %v167_v48, 1.0 }
  0xda   :  { %v170_v51 = vadd.f32 1.0, %v224_v49 }
  0xdc   :  { %v171_v52 = vmul.f32 %v170_v51, %v128_v50 }
  0xde   :  { %v172_v53 = vadd.f32 %v171_v52, %v45_v8 }
  0xe0   :  { %173 = vst [vmem:[#allocation7] sm:$0xff] %v172_v53 }
  0xe1   :  { %184 = dma.vmem_to_hbm [thread:$0]  %s180_s24, 128, %s182_s27, [#allocation4]  }
  0xe2   :  { %317 = dma.done.wait [#allocation4], 128  }
  0xe3   :  { %318 = vsyncadd [#allocation4], 4294967168 }
  0xe4   :  { %189 = vsyncpa [#allocation3], 1 }
  0xe5   :  { %190 = vsyncpa [#allocation6], 1 }
  0xe6   :  { %191 = vsyncpa [#allocation4], 1 }

// kernel: tpu_custom_call.1
= control target key start
LH: loop header
LB: loop body
LE: loop exit
PB: predicated region body
PF: predicated region fallthrough
CT: control target
= control target key end

     0   :  { %8 = vsyncpa [#allocation3], 0  ;;  %s356_s0 = inlined_call_operand.hbm [shape: f32[8,128], index: 0, kind: input, shape index: {}]   ;;  %s357_s1 = inlined_call_operand.hbm [shape: bf16[128,128], index: 1, kind: input, shape index: {}]   ;;  %s358_s2 = inlined_call_operand.vmem [shape: f32[1,128], index: 2, kind: input, shape index: {}]   ;;  %s359_s3 = inlined_call_operand.hbm [shape: f32[8,128], index: 3, kind: output, shape index: {}]  }
   0x1   :  { %9 = vsyncpa [#allocation6], 0 }
   0x2   :  { %10 = vsyncpa [#allocation4], 0  ;;  %s16_s14 = sshll.u32 %s356_s0, 4  ;;  %s319_s15 = smov [#allocation2]   ;;  %s17_s14 = int_to_ptr.hbm [resolvable:$true] %s16_s14 }
   0x3   :  { %s18_s16 = sshll.u32 %s319_s15, 4  ;;  %s26_s19 = sshll.u32 %s357_s1, 4  ;;  %s19_s16 = int_to_ptr.vmem [resolvable:$true] %s18_s16  ;;  %s27_s19 = int_to_ptr.hbm [resolvable:$true] %s26_s19 }
   0x4   :  { %21 = dma.hbm_to_vmem [thread:$0]  %s17_s14, 128, %s19_s16, [#allocation3]  }
   0x5   :  { %s320_s20 = smov [#allocation5]   ;;  %s321_s22 = smov 64  }
   0x6   :  { %s28_s21 = sshll.u32 %s320_s20, 4  ;;  %s322_s23 = smov 4   ;;  %s29_s21 = int_to_ptr.vmem [resolvable:$true] %s28_s21 }
   0x7   :  { %34 = dma.hbm_to_vmem [thread:$0]  %s27_s19, 1024, %s29_s21, [#allocation6], %s321_s22, %s321_s22, %s322_s23  }
   0x8   :  { %313 = dma.done.wait [#allocation3], 128  }
   0x9   :  { %314 = vsyncadd [#allocation3], 4294967168 }
   0xa   :  { %315 = dma.done.wait [#allocation6], 1024  }
   0xb   :  { %316 = vsyncadd [#allocation6], 4294966272  ;;  %v232_v0 = vld [vmem:[#allocation5 + $0x38] sm:$0xff]  ;;  %v231_v1 = vld [vmem:[#allocation5 + $0x30] sm:$0xff]  ;;  %s181_s27 = sshll.u32 %s359_s3, 4  ;;  %s182_s27 = int_to_ptr.hbm [resolvable:$true] %s181_s27 }
   0xc   :  { %115 = vmatpush.bf16.msra.mxu0 %v232_v0  ;;  %v230_v2 = vld [vmem:[#allocation5 + $0x28] sm:$0xff]  ;;  %v229_v3 = vld [vmem:[#allocation5 + $0x20] sm:$0xff]  ;;  %v228_v4 = vld [vmem:[#allocation5 + $0x18] sm:$0xff] }
   0xd   :  { %v227_v5 = vld [vmem:[#allocation5 + $0x10] sm:$0xff]  ;;  %v226_v6 = vld [vmem:[#allocation5 + $0x8] sm:$0xff]  ;;  %v225_v7 = vld [vmem:[#allocation5] sm:$0xff] }
   0xe   :  { %v45_v8 = vld [vmem:[#allocation2] sm:$0xff] }
   0xf   :  { %v46_v9 = vpack.c.bf16 %v45_v8, %v45_v8  ;;  %v238_v10 = vld [vmem:[%s358_s2] ss:$0 sm:$0xff]  ;;  %s323_s2 = smov [#allocation7]  }
  0x10   :  { %116 = vmatpush.bf16.msra.mxu0 %v231_v1  ;;  %s179_s24 = sshll.u32 %s323_s2, 4  ;;  %s180_s24 = int_to_ptr.vmem [resolvable:$true] %s179_s24 }
  0x14   :  { %117 = vmatpush.bf16.msra.mxu0 %v230_v2 }
  0x18   :  { %118 = vmatpush.bf16.msra.mxu0 %v229_v3 }
  0x1c   :  { %119 = vmatpush.bf16.msra.mxu0 %v228_v4 }
  0x20   :  { %120 = vmatpush.bf16.msra.mxu0 %v227_v5 }
  0x24   :  { %121 = vmatpush.bf16.msra.mxu0 %v226_v6 }
  0x28   :  { %122 = vmatpush.bf16.msra.mxu0 %v225_v7 }
  0x2b   :  { %123 = vmatmul.bf16.vlgmr.msra.gmra.mxu0 %v46_v9 }
  0xa8   :  { %v124_v11 = vpop.f32.mrf.mxu0 }
  0xa9   :  { %v125_v12 = vadd.f32 %v238_v10, %v124_v11 }
  0xab   :  { %v129_v13 = vmul.f32 0.70710677, %v125_v12  ;;  %v128_v50 = vmul.f32 0.5, %v125_v12 }
  0xad   :  { %v130_v14 = vmul.f32 %v129_v13, %v129_v13 }
  0xaf   :  { %v131_v15 = vmin.f32 %v130_v14, 16.0 }
  0xb0   :  { %v126_v16 = vpop.f32.mrf.mxu0 }
  0xb1   :  { %v132_v17 = vmul.f32 2.1237322e-06, %v131_v15  ;;  %v143_v18 = vmul.f32 3.8918573e-05, %v131_v15 }
  0xb3   :  { %v133_v19 = vadd.f32 0.00028619796, %v132_v17  ;;  %v144_v20 = vadd.f32 0.001143296, %v143_v18 }
  0xb5   :  { %v134_v21 = vmul.f32 %v133_v19, %v131_v15  ;;  %v145_v22 = vmul.f32 %v144_v20, %v131_v15 }
  0xb7   :  { %v146_v23 = vadd.f32 0.014752088, %v145_v22  ;;  %v135_v24 = vadd.f32 0.0036580483, %v134_v21 }
  0xb9   :  { %v147_v25 = vmul.f32 %v146_v23, %v131_v15  ;;  %v136_v27 = vmul.f32 %v135_v24, %v131_v15 }
  0xbb   :  { %v148_v26 = vadd.f32 0.112945676, %v147_v25  ;;  %v137_v30 = vadd.f32 0.05243302, %v136_v27 }
  0xbd   :  { %v149_v28 = vmul.f32 %v148_v26, %v131_v15  ;;  %v138_v33 = vmul.f32 %v137_v30, %v131_v15 }
  0xbf   :  { %v150_v29 = vadd.f32 0.4994258, %v149_v28  ;;  %v139_v34 = vadd.f32 0.18741608, %v138_v33 }
  0xc1   :  { %v151_v31 = vmul.f32 %v150_v29, %v131_v15  ;;  %v140_v36 = vmul.f32 %v139_v34, %v131_v15 }
  0xc3   :  { %v152_v32 = vadd.f32 1.0, %v151_v31  ;;  %v141_v40 = vadd.f32 1.1283791, %v140_v36 }
  0xc5   :  { %239 = vrcp.f32 %v152_v32  ;;  %v164_v39 = vand.u32 2147483648, %v152_v32  ;;  %v162_v42 = vand.u32 2147483647, %v152_v32  ;;  %vm158_vm1 = vweird.f32 %v152_v32 }
  0xc6   :  { %v142_v45 = vmul.f32 %v141_v40, %v129_v13 }
  0xc7   :  { %v165_v44 = vor.u32 1.1754944e-38, %v164_v39  ;;  %vm163_vm3 = vcmp.eq.f32.partialorder %v162_v42, 8.507059e+37 }
  0xcb   :  { %v240_v35 = vpop.eup %239 }
  0xcc   :  { %v154_v37 = vmul.f32 %v240_v35, %v152_v32  ;;  %vm159_vm0 = vweird.f32 %v240_v35 }
  0xcd   :  { %vm160_vm2 = vmor %vm158_vm1, %vm159_vm0 }
  0xce   :  { %v155_v38 = vsub.f32 1.0, %v154_v37 }
  0xd0   :  { %v156_v41 = vmul.f32 %v240_v35, %v155_v38 }
  0xd2   :  { %v157_v43 = vadd.f32 %v240_v35, %v156_v41 }
  0xd4   :  { %v161_v46 = vsel %vm160_vm2, %v240_v35, %v157_v43 }
  0xd5   :  { %v166_v47 = vsel %vm163_vm3, %v165_v44, %v161_v46 }
  0xd6   :  { %v167_v48 = vmul.f32 %v166_v47, %v142_v45 }
  0xd8   :  { %v224_v49 = vclamps-f32 %v167_v48, 1.0 }
  0xda   :  { %v170_v51 = vadd.f32 1.0, %v224_v49 }
  0xdc   :  { %v171_v52 = vmul.f32 %v170_v51, %v128_v50 }
  0xde   :  { %v172_v53 = vadd.f32 %v171_v52, %v45_v8 }
  0xe0   :  { %173 = vst [vmem:[#allocation7] sm:$0xff] %v172_v53 }
  0xe1   :  { %184 = dma.vmem_to_hbm [thread:$0]  %s180_s24, 128, %s182_s27, [#allocation4]  }
  0xe2   :  { %317 = dma.done.wait [#allocation4], 128  }
  0xe3   :  { %318 = vsyncadd [#allocation4], 4294967168 }
  0xe4   :  { %189 = vsyncpa [#allocation3], 1 }
  0xe5   :  { %190 = vsyncpa [#allocation6], 1 }
  0xe6   :  { %191 = vsyncpa [#allocation4], 1 }

</bundles_post_ra>
